<compile_context>
chip_gen: v5e
topology: v5e:2x2
jax: 0.10.0
libtpu: 0.0.40
codegen_flags: <defaults>
</compile_context>

<pallas_src>
import functools

import jax
import jax.numpy as jnp
from jax import lax
from jax.experimental import pallas as pl
from jax.experimental.pallas import tpu as pltpu

_LANES = 128
_SUBLANES = 8
_TILE_TARGET_BYTES = 2 << 20  # ~2 MiB of input streamed per grid step


def _ceil_to(a: int, b: int) -> int:
    return -(-a // b) * b


def _ipow(x, p: int):
    """x**p via exponentiation-by-squaring, unrolled at trace time (VPU muls)."""
    result = None
    base = x
    n = p
    while n > 0:
        if n & 1:
            result = base if result is None else result * base
        n >>= 1
        if n:
            base = base * base
    return result


def _pow_sum_kernel(x_ref, out_ref, acc_ref, *, p: int, scale: float,
                    nrows: int, tile_rows: int):
    """Accumulate sum(x**p) into a vreg-sized (8,128) accumulator.

    x_ref   : VMEM (tile_rows, 128) input tile (original dtype)
    out_ref : VMEM (1, 1) f32 -- scale * total sum, written in the epilogue
    acc_ref : VMEM (8, 128) f32 scratch accumulator (persists across grid)
    """
    i = pl.program_id(0)
    last = pl.num_programs(0) - 1

    @pl.when(i == 0)
    def _init():
        acc_ref[...] = jnp.zeros_like(acc_ref)

    x = x_ref[...].astype(jnp.float32)
    xp = _ipow(x, p)

    def partial_sum(v):
        # (tile_rows,128) -> (tile_rows//8, 8, 128); leading-axis sum lowers to
        # plain vreg adds (no cross-lane traffic).
        return jnp.sum(v.reshape(tile_rows // _SUBLANES, _SUBLANES, _LANES),
                       axis=0)

    # Rows valid in the final (possibly partial) block -- static Python int.
    tail_rows = nrows - (nrows // tile_rows) * tile_rows
    if tail_rows == 0:
        tail_rows = tile_rows

    if tail_rows == tile_rows:
        # Every block is full: single unmasked fast path.
        acc_ref[...] += partial_sum(xp)
    else:
        @pl.when(i < last)
        def _full_tiles():
            acc_ref[...] += partial_sum(xp)

        @pl.when(i == last)
        def _ragged_tail():
            # Mask garbage rows of the padded boundary block (row granularity).
            row_idx = lax.broadcasted_iota(jnp.int32, xp.shape, 0)
            masked = jnp.where(row_idx < tail_rows, xp, 0.0)
            acc_ref[...] += partial_sum(masked)

    @pl.when(i == last)
    def _epilogue():
        # One cross-lane/cross-sublane reduce + fold in scale (incl. weight_decay).
        out_ref[...] = (scale * jnp.sum(acc_ref[...], keepdims=True)
                        ).astype(out_ref.dtype)


def _table_pow_sum(emb, *, p: int, scale: float):
    """Return a (1,1) f32 array = scale * sum(emb**p), streamed via Pallas."""
    itemsize = emb.dtype.itemsize
    packing = max(1, 4 // itemsize)          # rows packed per sublane
    min_rows = _SUBLANES * packing           # 8 (f32), 16 (bf16), 32 (int8/fp8)

    flat = emb.reshape(-1)
    size = int(flat.shape[0])
    if size % _LANES != 0:
        # Only truly ragged tables pay for a (small) zero-pad copy; zeros are
        # exact for integer p >= 1 since 0**p == 0.
        flat = jnp.pad(flat, (0, _ceil_to(size, _LANES) - size))
    x2d = flat.reshape(-1, _LANES)           # free metadata reshape when aligned
    nrows = int(x2d.shape[0])

    max_rows = max(min_rows,
                   (_TILE_TARGET_BYTES // (_LANES * itemsize))
                   // min_rows * min_rows)
    tile_rows = min(max_rows, _ceil_to(nrows, min_rows))
    num_tiles = pl.cdiv(nrows, tile_rows)

    return pl.pallas_call(
        functools.partial(_pow_sum_kernel, p=p, scale=scale,
                          nrows=nrows, tile_rows=tile_rows),
        out_shape=jax.ShapeDtypeStruct((1, 1), jnp.float32),
        grid_spec=pltpu.PrefetchScalarGridSpec(
            num_scalar_prefetch=0,
            grid=(num_tiles,),
            in_specs=[pl.BlockSpec((tile_rows, _LANES), lambda i: (i, 0))],
            out_specs=pl.BlockSpec((1, 1), lambda i: (0, 0)),
            scratch_shapes=[pltpu.VMEM((_SUBLANES, _LANES), jnp.float32)],
        ),
        compiler_params=pltpu.CompilerParams(
            dimension_semantics=("arbitrary",),   # grid axis is a reduction
        ),
    )(x2d)


def embedding_regularization(*embs, p: int = 2, weight_decay: float = 1e-4):
    """JAX/Pallas equivalent of EmbeddingRegularization.forward."""
    assert isinstance(p, int) and p >= 1, "requires integer p >= 1"
    total = jnp.zeros((), jnp.float32)
    for emb in embs:
        if emb.ndim < 2:
            raise ValueError("embeddings must have at least 2 dimensions")
        if emb.size == 0:
            continue                      # skip empty tables (avoids 1/0)
        denom = emb.size // emb.shape[1]  # == N for 2-D embeddings
        scale = float(weight_decay) / (p * denom)
        total = total + _table_pow_sum(emb, p=p, scale=scale)[0, 0]
    return total


if __name__ == "__main__":
    key = jax.random.PRNGKey(0)
    k1, k2, k3 = jax.random.split(key, 3)
    # Small embedding tables (num_items, hidden); emb3 exercises the ragged
    # (numel not a multiple of 128) padding path, emb1/emb2 the zero-copy path.
    emb1 = jax.random.normal(k1, (16, 32), dtype=jnp.float32)
    emb2 = jax.random.normal(k2, (8, 32), dtype=jnp.float32)
    emb3 = jax.random.normal(k3, (10, 48), dtype=jnp.float32)

    loss = embedding_regularization(emb1, emb2, emb3, p=2, weight_decay=1e-4)
    loss = jax.block_until_ready(loss)

    # Reference check (plain JAX) — same math as the PyTorch module.
    ref = 1e-4 * sum(
        (1.0 / 2) * jnp.mean(jnp.sum(e ** 2, axis=1))
        for e in (emb1, emb2, emb3)
    )
    assert jnp.allclose(loss, ref, rtol=1e-5, atol=1e-8), (loss, ref)

    print("KERNEL_OK")
</pallas_src>

<mosaic_0001>
module attributes {stable_mosaic.version = 11 : i64} {
  func.func @_pow_sum_kernel(%arg0: i32, %arg1: memref<8x128xf32, #tpu.memory_space<vmem>>, %arg2: memref<1x1xf32, #tpu.memory_space<vmem>>, %arg3: memref<8x128xf32, #tpu.memory_space<vmem>>) attributes {dimension_semantics = [#tpu.dimension_semantics<arbitrary>], iteration_bounds = array<i64: 1>, scalar_prefetch = 0 : i64, scratch_operands = 1 : i64, tpu.core_type = #tpu.core_type<tc>, window_params = [{transform_indices = @transform_0, window_bounds = array<i64: 8, 128>}, {pipeline_mode = #tpu.pipeline_mode<synchronous>, transform_indices = @transform_1, window_bounds = array<i64: 1, 1>}]} {
    %c0_i32 = arith.constant 0 : i32
    %0 = arith.cmpi eq, %arg0, %c0_i32 : i32
    %1 = arith.extui %0 : i1 to i32
    %c0_i32_0 = arith.constant 0 : i32
    %2 = arith.cmpi ne, %1, %c0_i32_0 : i32
    scf.if %2 {
      %cst = arith.constant 0.000000e+00 : f32
      %14 = vector.broadcast %cst : f32 to vector<8x128xf32>
      %c0_8 = arith.constant 0 : index
      %c0_9 = arith.constant 0 : index
      %15 = vector.load %arg3[%c0_8, %c0_9] : memref<8x128xf32, #tpu.memory_space<vmem>>, vector<8x128xf32>
      tpu.vector_store %arg3[%c0_8, %c0_9], %14 {strides = array<i32>} : memref<8x128xf32, #tpu.memory_space<vmem>>, vector<8x128xf32>,
    } else {
    }
    %c0 = arith.constant 0 : index
    %c0_1 = arith.constant 0 : index
    %3 = vector.load %arg1[%c0, %c0_1] : memref<8x128xf32, #tpu.memory_space<vmem>>, vector<8x128xf32>
    %4 = arith.mulf %3, %3 : vector<8x128xf32>
    %c0_i32_2 = arith.constant 0 : i32
    %5 = arith.cmpi slt, %arg0, %c0_i32_2 : i32
    %6 = arith.extui %5 : i1 to i32
    %c0_i32_3 = arith.constant 0 : i32
    %7 = arith.cmpi ne, %6, %c0_i32_3 : i32
    scf.if %7 {
      %c0_8 = arith.constant 0 : index
      %c0_9 = arith.constant 0 : index
      %14 = vector.load %arg3[%c0_8, %c0_9] : memref<8x128xf32, #tpu.memory_space<vmem>>, vector<8x128xf32>
      %15 = vector.shape_cast %4 : vector<8x128xf32> to vector<1x8x128xf32>
      %cst = arith.constant dense<0.000000e+00> : vector<8x128xf32>
      %16 = vector.multi_reduction <add>, %15, %cst [0] : vector<1x8x128xf32> to vector<8x128xf32>
      %17 = arith.addf %14, %16 : vector<8x128xf32>
      %c0_10 = arith.constant 0 : index
      %c0_11 = arith.constant 0 : index
      %18 = vector.load %arg3[%c0_10, %c0_11] : memref<8x128xf32, #tpu.memory_space<vmem>>, vector<8x128xf32>
      tpu.vector_store %arg3[%c0_10, %c0_11], %17 {strides = array<i32>} : memref<8x128xf32, #tpu.memory_space<vmem>>, vector<8x128xf32>,
    } else {
    }
    %c0_i32_4 = arith.constant 0 : i32
    %8 = arith.cmpi eq, %arg0, %c0_i32_4 : i32
    %9 = arith.extui %8 : i1 to i32
    %c0_i32_5 = arith.constant 0 : i32
    %10 = arith.cmpi ne, %9, %c0_i32_5 : i32
    scf.if %10 {
      %14 = tpu.iota {dimensions = array<i32: 0>} : vector<8x128xi32>
      %c4_i32 = arith.constant 4 : i32
      %15 = vector.broadcast %c4_i32 : i32 to vector<8x128xi32>
      %16 = arith.cmpi slt, %14, %15 : vector<8x128xi32>
      %cst = arith.constant 0.000000e+00 : f32
      %17 = vector.broadcast %cst : f32 to vector<8x128xf32>
      %18 = arith.select %16, %4, %17 : vector<8x128xi1>, vector<8x128xf32>
      %c0_8 = arith.constant 0 : index
      %c0_9 = arith.constant 0 : index
      %19 = vector.load %arg3[%c0_8, %c0_9] : memref<8x128xf32, #tpu.memory_space<vmem>>, vector<8x128xf32>
      %20 = vector.shape_cast %18 : vector<8x128xf32> to vector<1x8x128xf32>
      %cst_10 = arith.constant dense<0.000000e+00> : vector<8x128xf32>
      %21 = vector.multi_reduction <add>, %20, %cst_10 [0] : vector<1x8x128xf32> to vector<8x128xf32>
      %22 = arith.addf %19, %21 : vector<8x128xf32>
      %c0_11 = arith.constant 0 : index
      %c0_12 = arith.constant 0 : index
      %23 = vector.load %arg3[%c0_11, %c0_12] : memref<8x128xf32, #tpu.memory_space<vmem>>, vector<8x128xf32>
      tpu.vector_store %arg3[%c0_11, %c0_12], %22 {strides = array<i32>} : memref<8x128xf32, #tpu.memory_space<vmem>>, vector<8x128xf32>,
    } else {
    }
    %c0_i32_6 = arith.constant 0 : i32
    %11 = arith.cmpi eq, %arg0, %c0_i32_6 : i32
    %12 = arith.extui %11 : i1 to i32
    %c0_i32_7 = arith.constant 0 : i32
    %13 = arith.cmpi ne, %12, %c0_i32_7 : i32
    scf.if %13 {
      %c0_8 = arith.constant 0 : index
      %c0_9 = arith.constant 0 : index
      %14 = vector.load %arg3[%c0_8, %c0_9] : memref<8x128xf32, #tpu.memory_space<vmem>>, vector<8x128xf32>
      %15 = vector.shape_cast %14 : vector<8x128xf32> to vector<1x8x128xf32>
      %cst = arith.constant dense<0.000000e+00> : vector<1xf32>
      %16 = vector.multi_reduction <add>, %15, %cst [1, 2] : vector<1x8x128xf32> to vector<1xf32>
      %17 = vector.shape_cast %16 : vector<1xf32> to vector<1x1x1xf32>
      %18 = vector.extract %17[0, 0, 0] : f32 from vector<1x1x1xf32>
      %19 = vector.broadcast %18 : f32 to vector<1x1xf32>
      %cst_10 = arith.constant 3.125000e-06 : f32
      %20 = vector.broadcast %cst_10 : f32 to vector<1x1xf32>
      %21 = arith.mulf %20, %19 : vector<1x1xf32>
      %c0_11 = arith.constant 0 : index
      %c0_12 = arith.constant 0 : index
      %22 = vector.load %arg2[%c0_11, %c0_12] : memref<1x1xf32, #tpu.memory_space<vmem>>, vector<1x1xf32>
      tpu.vector_store %arg2[%c0_11, %c0_12], %21 {strides = array<i32>} : memref<1x1xf32, #tpu.memory_space<vmem>>, vector<1x1xf32>,
    } else {
    }
    return
  }
  func.func @transform_0(%arg0: i32) -> (i32, i32) {
    %c0_i32 = arith.constant 0 : i32
    %c0_i32_0 = arith.constant 0 : i32
    return %arg0, %c0_i32 : i32, i32
  }
  func.func @transform_1(%arg0: i32) -> (i32, i32) {
    %c0_i32 = arith.constant 0 : i32
    %c0_i32_0 = arith.constant 0 : i32
    %c0_i32_1 = arith.constant 0 : i32
    return %c0_i32, %c0_i32_0 : i32, i32
  }
}

</mosaic_0001>

<bundles_post_ra>
// kernel: tpu_custom_call.1
= control target key start
LH: loop header
LB: loop body
LE: loop exit
PB: predicated region body
PF: predicated region fallthrough
CT: control target
= control target key end

     0   :  { %6 = vsyncpa [#allocation4], 0  ;;  %s160_s0 = inlined_call_operand.hbm [shape: f32[4,128], index: 0, kind: input, shape index: {}]   ;;  %s161_s1 = inlined_call_operand.hbm [shape: f32[1,1], index: 1, kind: output, shape index: {}]  }
   0x1   :  { %7 = vsyncpa [#allocation5], 0 }
   0x2   :  { %11 = vsyncadd [#allocation4], 64  ;;  %s12_s8 = sshll.u32 %s160_s0, 4  ;;  %s140_s9 = smov [#allocation3]   ;;  %s13_s8 = int_to_ptr.hbm [resolvable:$true] %s12_s8 }
   0x3   :  { %s14_s10 = sshll.u32 %s140_s9, 4  ;;  %s141_s11 = smov 64   ;;  %s15_s10 = int_to_ptr.vmem [resolvable:$true] %s14_s10 }
   0x4   :  { %s142_s12 = smov 4  }
   0x5   :  { %20 = dma.hbm_to_vmem [thread:$0]  %s13_s8, 64, %s15_s10, [#allocation4], %s141_s11, %s141_s11, %s142_s12  }
   0x6   :  { %136 = dma.done.wait [#allocation4], 128  }
   0x7   :  { %137 = vsyncadd [#allocation4], 4294967168  ;;  %v43_v0 = vlaneseq  ;;  %v30_v2 = vld [vmem:[#allocation3] sm:$0xff]  ;;  %s143_s0 = smov [#allocation6]   ;;  %s72_s16 = sshll.u32 %s161_s1, 4  ;;  %vm63_vm1 = vcmask 0   ;;  %s73_s16 = int_to_ptr.hbm [resolvable:$true] %s72_s16 }
   0x8   :  { %v31_v3 = vmul.f32 %v30_v2, %v30_v2  ;;  %s70_s13 = sshll.u32 %s143_s0, 4  ;;  %s71_s13 = int_to_ptr.vmem [resolvable:$true] %s70_s13 }
   0x9   :  { %v44_v1 = vshrl.u32 %v43_v0, 7 }
   0xb   :  { %vm45_vm0 = vcmp.lt.s32.totalorder %v44_v1, 4 }
   0xc   :  { %v46_v4 = vsel %vm45_vm0, %v31_v3, 0.0 }
   0xd   :  { %52 = vadd.xlane.f32.xlu0 %v46_v4 }
  0x80   :  { %v53_v5 = vpop.xlane.xlu0 %52 }
  0x81   :  { %v54_v6 = vrot.slane %v53_v5, 4 }
  0x83   :  { %v55_v7 = vadd.f32 %v54_v6, %v53_v5 }
  0x85   :  { %v56_v8 = vrot.slane %v55_v7, 2 }
  0x87   :  { %v57_v9 = vadd.f32 %v56_v8, %v55_v7 }
  0x89   :  { %v58_v10 = vrot.slane %v57_v9, 1 }
  0x8b   :  { %v59_v11 = vadd.f32 %v58_v10, %v57_v9 }
  0x8d   :  { %82 = vpush %v59_v11 }
  0xbe   :  { %s83_s17 = spop %82 }
  0xbf   :  { %v61_v12 = vstv %s83_s17 }
  0xc0   :  { %v62_v13 = vmul.f32 3.125e-06, %v61_v12 }
  0xc2   :  { %64 = vst.msk [vmem:[#allocation6] sm:$0x1] %vm63_vm1, %v62_v13 }
  0xc3   :  { %75 = dma.vmem_to_hbm [thread:$0]  %s71_s13, 16, %s73_s16, [#allocation5]  }
  0xc4   :  { %138 = dma.done.wait [#allocation5], 16  }
  0xc5   :  { %139 = vsyncadd [#allocation5], 4294967280 }
  0xc6   :  { %80 = vsyncpa [#allocation4], 1 }
  0xc7   :  { %81 = vsyncpa [#allocation5], 1 }

</bundles_post_ra>
